<compile_context>
chip_gen: v7x
topology: tpu7x:2x2x1
jax: 0.10.0
libtpu: 0.0.40
codegen_flags: <defaults>
</compile_context>

<pallas_src>
import functools

import jax
import jax.numpy as jnp
import numpy as np
from jax.experimental import pallas as pl
from jax.experimental.pallas import tpu as pltpu


def _addcoords_kernel(row0_ref, col0_ref, x_ref, o_ref, *,
                      C, H, W, tile, with_r, spatial_axis):
    # row0_ref/col0_ref: (n_tiles,) int32 in SMEM (scalar prefetch): exact
    #   (row, col) of the first pixel of each flattened-spatial tile.
    # x_ref: (1, C, tile) block of the flattened input  (B, C,     H*W)
    # o_ref: (1, C_out, tile) block of the flattened output (B, C_out, H*W)

    # Pass-through of the original channels (bulk of the bytes).
    o_ref[:, :C, :] = x_ref[...]

    s = pl.program_id(spatial_axis)
    i0 = row0_ref[s]                      # exact row of lane 0 of this tile
    j0 = col0_ref[s]                      # exact col of lane 0 of this tile

    # Per-lane column offset within the tile. Everything below is exact
    # because q < W + tile << 2^24 and the one-step correction absorbs the
    # single-ulp rounding of the float division.
    t = jax.lax.broadcasted_iota(jnp.int32, (1, 1, tile), 2)
    q = (j0 + t).astype(jnp.float32)
    w = jnp.float32(W)
    di = jnp.floor((q + 0.5) / w)
    rem = q - di * w
    di = di + (rem >= w).astype(jnp.float32) - (rem < 0.0).astype(jnp.float32)
    j = q - di * w                        # exact column index in [0, W)
    i = i0.astype(jnp.float32) + di       # exact row index

    # Same arithmetic order as the PyTorch module: (idx / (dim-1)) * 2 - 1.
    # NOTE: H == 1 or W == 1 divides by zero (inf/nan), same as PyTorch.
    xx = (i / (H - 1)) * 2.0 - 1.0        # varies along H (x_dim)
    yy = (j / (W - 1)) * 2.0 - 1.0        # varies along W (y_dim)

    # Direct per-channel stores (no sublane concatenate / relayout).
    o_ref[:, C:C + 1, :] = xx.astype(o_ref.dtype)
    o_ref[:, C + 1:C + 2, :] = yy.astype(o_ref.dtype)
    if with_r:
        rr = jnp.sqrt((xx - 0.5) ** 2 + (yy - 0.5) ** 2)
        o_ref[:, C + 2:C + 3, :] = rr.astype(o_ref.dtype)


def _vmem_capacity_bytes(default=64 * 1024 * 1024):
    """Physical VMEM of the local generation (128 MiB v5e/v6e, 64 MiB v7x)."""
    try:
        info = pltpu.get_tpu_info()
        cap = getattr(info, "vmem_capacity_bytes", None)
        if cap:
            return int(cap)
    except Exception:
        pass
    return default


def _choose_spatial_tile(hw, bytes_per_lane, vmem_budget, min_tiles=1):
    """Pick the flattened-spatial tile (lane dim of the blocks).

    Preference order:
      1. largest multiple-of-128 divisor of hw that fits the budget and yields
         at least `min_tiles` grid steps  (dense stores, exact grid)
      2. single full-extent block, if it fits and min_tiles == 1
      3. largest multiple-of-128 tile fitting the budget; the edge block is
         partial and Pallas clips the out-of-bounds writeback.
    Returns (tile, n_tiles).
    """
    max_lanes = max(128, (vmem_budget // max(bytes_per_lane, 1)) // 128 * 128)

    if hw <= 128:
        return hw, 1

    # 1) dividing, lane-dense tile.
    best = 0
    t = 128
    limit = min(hw, max_lanes)
    while t <= limit:
        if hw % t == 0 and hw // t >= min_tiles:
            best = t
        t += 128
    if best:
        return best, hw // best

    # 2) one full-extent block (legal even if hw % 128 != 0).
    if min_tiles <= 1 and hw * bytes_per_lane <= vmem_budget:
        return hw, 1

    # 3) fixed lane-dense tile + partial edge block.
    tile = min(max_lanes, (hw // 128) * 128)
    while min_tiles > 1 and tile > 128 and tile * (min_tiles - 1) >= hw:
        tile -= 128
    return tile, int(pl.cdiv(hw, tile))


def add_coords(x: jax.Array, with_r: bool = False) -> jax.Array:
    """Pallas TPU implementation of AddCoords.forward for NCHW input."""
    B, C, H, W = x.shape
    n_extra = 3 if with_r else 2
    C_out = C + n_extra
    HW = H * W

    itemsize = x.dtype.itemsize
    row_pad = max(8, 32 // itemsize)               # sublane padding: 8 f32 / 16 bf16
    pad_up = lambda n: ((n + row_pad - 1) // row_pad) * row_pad
    # Double-buffered in+out blocks + ~10 f32 lanes of Mosaic elementwise temps.
    bytes_per_lane = 2 * (pad_up(C) + pad_up(C_out)) * itemsize + 10 * 4

    vmem_cap = _vmem_capacity_bytes()
    # ~21 MiB on v7x (64 MiB VMEM), 24 MiB on v5e/v6e (128 MiB VMEM).
    budget = min(vmem_cap // 3, 24 * 1024 * 1024)

    # Keep both v7x TensorCores busy for single-image calls.
    min_tiles = 2 if B == 1 else 1
    tile, n_tiles = _choose_spatial_tile(HW, bytes_per_lane, budget, min_tiles)

    # Free layout plumbing: flatten spatial dims so the lane dim is dense.
    x_flat = x.reshape(B, C, HW)

    # Exact per-tile (row, col) anchors, computed host-side in int64.
    starts = np.arange(n_tiles, dtype=np.int64) * tile
    row0 = jnp.asarray(starts // W, dtype=jnp.int32)
    col0 = jnp.asarray(starts % W, dtype=jnp.int32)

    # Put the larger extent first so megacore sharding always sees >=2 steps
    # on its leading parallel axis.
    spatial_first = n_tiles >= B
    if spatial_first:
        grid = (n_tiles, B)
        idx = lambda s, b, row0, col0: (b, 0, s)
        spatial_axis = 0
    else:
        grid = (B, n_tiles)
        idx = lambda b, s, row0, col0: (b, 0, s)
        spatial_axis = 1

    footprint = bytes_per_lane * tile
    vmem_limit = int(min(max(footprint + (8 << 20), 32 << 20), 48 << 20))

    kernel = functools.partial(
        _addcoords_kernel, C=C, H=H, W=W, tile=tile, with_r=with_r,
        spatial_axis=spatial_axis)

    out_flat = pl.pallas_call(
        kernel,
        out_shape=jax.ShapeDtypeStruct((B, C_out, HW), x.dtype),
        grid_spec=pltpu.PrefetchScalarGridSpec(
            num_scalar_prefetch=2,
            grid=grid,
            in_specs=[pl.BlockSpec((1, C, tile), idx)],
            out_specs=pl.BlockSpec((1, C_out, tile), idx),
        ),
        compiler_params=pltpu.CompilerParams(
            dimension_semantics=("parallel", "parallel"),
            vmem_limit_bytes=vmem_limit,
        ),
    )(row0, col0, x_flat)

    return out_flat.reshape(B, C_out, H, W)


def _add_coords_ref(x: jax.Array, with_r: bool = False) -> jax.Array:
    """Pure-JAX reference matching the PyTorch semantics exactly."""
    B, C, H, W = x.shape
    i = jnp.arange(H, dtype=jnp.float32)
    j = jnp.arange(W, dtype=jnp.float32)
    xx = ((i / (H - 1)) * 2.0 - 1.0)[None, None, :, None]
    yy = ((j / (W - 1)) * 2.0 - 1.0)[None, None, None, :]
    xx = jnp.broadcast_to(xx, (B, 1, H, W)).astype(x.dtype)
    yy = jnp.broadcast_to(yy, (B, 1, H, W)).astype(x.dtype)
    parts = [x, xx, yy]
    if with_r:
        rr = jnp.sqrt((xx - 0.5) ** 2 + (yy - 0.5) ** 2).astype(x.dtype)
        parts.append(rr)
    return jnp.concatenate(parts, axis=1)


if __name__ == "__main__":
    key = jax.random.PRNGKey(0)
    B, C, H, W = 2, 4, 16, 16
    x = jax.random.normal(key, (B, C, H, W), dtype=jnp.float32)

    # with_r=False (module default)
    out = jax.block_until_ready(add_coords(x, with_r=False))
    ref = _add_coords_ref(x, with_r=False)
    assert out.shape == (B, C + 2, H, W)
    assert jnp.allclose(out, ref, atol=1e-6), "mismatch (with_r=False)"

    # with_r=True path
    out_r = jax.block_until_ready(add_coords(x, with_r=True))
    ref_r = _add_coords_ref(x, with_r=True)
    assert out_r.shape == (B, C + 3, H, W)
    assert jnp.allclose(out_r, ref_r, atol=1e-6), "mismatch (with_r=True)"

    # B == 1 path: forced >= 2 spatial tiles (both v7x cores get work).
    x1 = jax.random.normal(jax.random.PRNGKey(0), (1, 3, 16, 16), jnp.float32)
    out1 = jax.block_until_ready(add_coords(x1, with_r=True))
    assert jnp.allclose(out1, _add_coords_ref(x1, with_r=True), atol=1e-6), \
        "mismatch (B=1)"

    # Odd H*W (no multiple-of-128 divisor) exercises the full-extent block path.
    x2 = jax.random.normal(jax.random.PRNGKey(0), (2, 5, 10, 13), jnp.float32)
    out2 = jax.block_until_ready(add_coords(x2, with_r=False))
    assert jnp.allclose(out2, _add_coords_ref(x2, with_r=False), atol=1e-6), \
        "mismatch (odd H*W)"

    print("KERNEL_OK")
</pallas_src>

<mosaic_0001>
module attributes {stable_mosaic.version = 11 : i64} {
  func.func @_addcoords_kernel(%arg0: i32, %arg1: i32, %arg2: memref<1xi32, #tpu.memory_space<smem>>, %arg3: memref<1xi32, #tpu.memory_space<smem>>, %arg4: memref<1x4x256xf32, #tpu.memory_space<vmem>>, %arg5: memref<1x6x256xf32, #tpu.memory_space<vmem>>) attributes {dimension_semantics = [#tpu.dimension_semantics<parallel>, #tpu.dimension_semantics<parallel>], iteration_bounds = array<i64: 2, 1>, scalar_prefetch = 2 : i64, scratch_operands = 0 : i64, tpu.core_type = #tpu.core_type<tc>, window_params = [{transform_indices = @transform_0, window_bounds = array<i64: 1, 4, 256>}, {transform_indices = @transform_1, window_bounds = array<i64: 1, 6, 256>}]} {
    %c0 = arith.constant 0 : index
    %c0_0 = arith.constant 0 : index
    %c0_1 = arith.constant 0 : index
    %0 = vector.load %arg4[%c0, %c0_0, %c0_1] : memref<1x4x256xf32, #tpu.memory_space<vmem>>, vector<1x4x256xf32>
    %c0_2 = arith.constant 0 : index
    %c0_3 = arith.constant 0 : index
    %c0_4 = arith.constant 0 : index
    %1 = vector.load %arg5[%c0_2, %c0_3, %c0_4] : memref<1x6x256xf32, #tpu.memory_space<vmem>>, vector<1x4x256xf32>
    tpu.vector_store %arg5[%c0_2, %c0_3, %c0_4], %0 {strides = array<i32>} : memref<1x6x256xf32, #tpu.memory_space<vmem>>, vector<1x4x256xf32>,
    %2 = arith.index_cast %arg1 : i32 to index
    %3 = memref.load %arg2[%2] : memref<1xi32, #tpu.memory_space<smem>>
    %4 = arith.index_cast %arg1 : i32 to index
    %5 = memref.load %arg3[%4] : memref<1xi32, #tpu.memory_space<smem>>
    %6 = tpu.iota {dimensions = array<i32: 2>} : vector<1x1x256xi32>
    %7 = vector.broadcast %5 : i32 to vector<1x1x256xi32>
    %8 = arith.addi %7, %6 : vector<1x1x256xi32>
    %9 = arith.sitofp %8 : vector<1x1x256xi32> to vector<1x1x256xf32>
    %cst = arith.constant 5.000000e-01 : f32
    %10 = vector.broadcast %cst : f32 to vector<1x1x256xf32>
    %11 = arith.addf %9, %10 : vector<1x1x256xf32>
    %cst_5 = arith.constant 1.600000e+01 : f32
    %12 = vector.broadcast %cst_5 : f32 to vector<1x1x256xf32>
    %13 = arith.divf %11, %12 : vector<1x1x256xf32>
    %14 = math.floor %13 : vector<1x1x256xf32>
    %cst_6 = arith.constant 1.600000e+01 : f32
    %15 = vector.broadcast %cst_6 : f32 to vector<1x1x256xf32>
    %16 = arith.mulf %14, %15 : vector<1x1x256xf32>
    %17 = arith.subf %9, %16 : vector<1x1x256xf32>
    %cst_7 = arith.constant 1.600000e+01 : f32
    %18 = vector.broadcast %cst_7 : f32 to vector<1x1x256xf32>
    %19 = arith.cmpf oge, %17, %18 : vector<1x1x256xf32>
    %20 = arith.extui %19 : vector<1x1x256xi1> to vector<1x1x256xi32>
    %21 = arith.sitofp %20 : vector<1x1x256xi32> to vector<1x1x256xf32>
    %22 = arith.addf %14, %21 : vector<1x1x256xf32>
    %cst_8 = arith.constant 0.000000e+00 : f32
    %23 = vector.broadcast %cst_8 : f32 to vector<1x1x256xf32>
    %24 = arith.cmpf olt, %17, %23 : vector<1x1x256xf32>
    %25 = arith.extui %24 : vector<1x1x256xi1> to vector<1x1x256xi32>
    %26 = arith.sitofp %25 : vector<1x1x256xi32> to vector<1x1x256xf32>
    %27 = arith.subf %22, %26 : vector<1x1x256xf32>
    %cst_9 = arith.constant 1.600000e+01 : f32
    %28 = vector.broadcast %cst_9 : f32 to vector<1x1x256xf32>
    %29 = arith.mulf %27, %28 : vector<1x1x256xf32>
    %30 = arith.subf %9, %29 : vector<1x1x256xf32>
    %31 = arith.sitofp %3 : i32 to f32
    %32 = vector.broadcast %31 : f32 to vector<1x1x256xf32>
    %33 = arith.addf %32, %27 : vector<1x1x256xf32>
    %cst_10 = arith.constant 1.500000e+01 : f32
    %34 = vector.broadcast %cst_10 : f32 to vector<1x1x256xf32>
    %35 = arith.divf %33, %34 : vector<1x1x256xf32>
    %cst_11 = arith.constant 2.000000e+00 : f32
    %36 = vector.broadcast %cst_11 : f32 to vector<1x1x256xf32>
    %37 = arith.mulf %35, %36 : vector<1x1x256xf32>
    %cst_12 = arith.constant 1.000000e+00 : f32
    %38 = vector.broadcast %cst_12 : f32 to vector<1x1x256xf32>
    %39 = arith.subf %37, %38 : vector<1x1x256xf32>
    %cst_13 = arith.constant 1.500000e+01 : f32
    %40 = vector.broadcast %cst_13 : f32 to vector<1x1x256xf32>
    %41 = arith.divf %30, %40 : vector<1x1x256xf32>
    %cst_14 = arith.constant 2.000000e+00 : f32
    %42 = vector.broadcast %cst_14 : f32 to vector<1x1x256xf32>
    %43 = arith.mulf %41, %42 : vector<1x1x256xf32>
    %cst_15 = arith.constant 1.000000e+00 : f32
    %44 = vector.broadcast %cst_15 : f32 to vector<1x1x256xf32>
    %45 = arith.subf %43, %44 : vector<1x1x256xf32>
    %c0_16 = arith.constant 0 : index
    %c4 = arith.constant 4 : index
    %c0_17 = arith.constant 0 : index
    %46 = vector.load %arg5[%c0_16, %c4, %c0_17] : memref<1x6x256xf32, #tpu.memory_space<vmem>>, vector<1x1x256xf32>
    tpu.vector_store %arg5[%c0_16, %c4, %c0_17], %39 {strides = array<i32>} : memref<1x6x256xf32, #tpu.memory_space<vmem>>, vector<1x1x256xf32>,
    %c0_18 = arith.constant 0 : index
    %c5 = arith.constant 5 : index
    %c0_19 = arith.constant 0 : index
    %47 = vector.load %arg5[%c0_18, %c5, %c0_19] : memref<1x6x256xf32, #tpu.memory_space<vmem>>, vector<1x1x256xf32>
    tpu.vector_store %arg5[%c0_18, %c5, %c0_19], %45 {strides = array<i32>} : memref<1x6x256xf32, #tpu.memory_space<vmem>>, vector<1x1x256xf32>,
    return
  }
  func.func @transform_0(%arg0: i32, %arg1: i32, %arg2: memref<1xi32, #tpu.memory_space<smem>>, %arg3: memref<1xi32, #tpu.memory_space<smem>>) -> (i32, i32, i32) {
    %c0_i32 = arith.constant 0 : i32
    %c0_i32_0 = arith.constant 0 : i32
    return %arg0, %c0_i32, %arg1 : i32, i32, i32
  }
  func.func @transform_1(%arg0: i32, %arg1: i32, %arg2: memref<1xi32, #tpu.memory_space<smem>>, %arg3: memref<1xi32, #tpu.memory_space<smem>>) -> (i32, i32, i32) {
    %c0_i32 = arith.constant 0 : i32
    %c0_i32_0 = arith.constant 0 : i32
    return %arg0, %c0_i32, %arg1 : i32, i32, i32
  }
}

</mosaic_0001>

<bundles_post_ra>
// kernel: tpu_custom_call.1
= control target key start
LH: loop header
LB: loop body
LE: loop exit
PB: predicated region body
PF: predicated region fallthrough
CT: control target
= control target key end

     0   :  { %s700_s0 = inlined_call_operand.<no memory space> [shape: s32[1], index: 0, kind: input, shape index: {}]   ;;  %s701_s1 = inlined_call_operand.<no memory space> [shape: s32[1], index: 1, kind: input, shape index: {}]   ;;  %s702_s2 = inlined_call_operand.hbm [shape: f32[2,4,256], index: 2, kind: input, shape index: {}]   ;;  %s703_s3 = inlined_call_operand.vmem [shape: f32[2,6,256], index: 3, kind: output, shape index: {}]  }
   0x1   :  { %8 = sst [smem:[#allocation3]] %s700_s0 }
   0x2   :  { %9 = sst [smem:[#allocation4]] %s701_s1 }
   0x3   :  { %10 = vsyncpa [#allocation6], 0 }
   0x4   :  { %12 = vsyncpa [#allocation6 + $0x1], 0  ;;  %s566_s16 = smov 0   ;;  %s568_s17 = smov 0  }
   0x5   :  { %s570_s18 = smov 0   ;;  %s572_s19 = smov 0  }
   0x6   :  { %s574_s20 = smov 0   ;;  %s576_s21 = smov 0  }
   0x7 LB: > { %s372_s0 = sadd.s32 4294967295, %s535_s21   ;;  %s30_s1 = sadd.s32 1, %s531_s20  ;;  %s535_s21 = sphi %s576_s21, %s18_s21   ;;  %s531_s20 = sphi %s574_s20, %s713_s20   ;;  %s527_s19 = sphi %s572_s19, %s712_s19   ;;  %s523_s18 = sphi %s570_s18, %s711_s18   ;;  %s519_s17 = sphi %s568_s17, %s710_s17   ;;  %s515_s16 = sphi %s566_s16, %s709_s16  }
   0x8   : > { %p32_p0 = scmp.ge.s32.totalorder %s30_s1, 2  ;;  %s39_s22 = sadd.s32 1, %s523_s18 }
   0x9   : > { %p46_p1 = scmp.ne.s32.totalorder %s523_s18, %s519_s17  ;;  %p47_p2 = scmp.eq.s32.totalorder %s535_s21, 0 }
   0xa   : > { %s715_s1 = smov (%p32_p0, %s30_s1), 0  ;;  %p52_p4 = scmp.ne.s32.totalorder %s519_s17, %s515_s16 }
   0xb   : > { %p602_p3 = por %p47_p2, %p46_p1  ;;  %s34_s24 = ssub.s32 %s531_s20, %s715_s1 }
   0xc   : > { %p53_p5 = scmp.eq.s32.totalorder %s372_s0, 0  ;;  %p37_p6 = scmp.eq.s32.totalorder %s34_s24, 0 }
   0xd   : > { %p403_p8 = scmp.lt.s32.totalorder %s535_s21, 2  ;;  %s104_s27 = sand.u32 1, %s523_s18  }
   0xe   : > { %p609_p7 = por %p53_p5, %p52_p4  ;;  %s395_s28 = sshll.u32 %s531_s20, 7 }
   0xf   : > { %s615_s26 = scalar_select %p37_p6, %s523_s18, %s39_s22  }
  0x10   : > { %s376_s29 = sshll.u32 %s104_s27, 3  ;;  %s622_s5 = scalar_lea.hbm %s702_s2, %s395_s28 }
  0x11   : > { %s108_s6 = scalar_lea.vmem [#allocation5], %s376_s29  ;;  %p626_p9 = pnand %p403_p8, %p602_p3 }
  0x12   : > { %s118_s7 = sshll.u32 %s108_s6, 4  ;;  %s105_s9 = scalar_lea.sflag [#allocation6], %s104_s27  ;;  %s630_s7 = int_to_ptr.vmem [resolvable:$true] %s118_s7 }
  0x13   : > { %s455_s10 = scalar_lea.hbm %s622_s5, 128  ;;  %p457_p13 = pneg %p626_p9 }
  0x14   : > { %p456_p12 = scmp.ne.s32.totalorder %s622_s5, %s455_s10  ;;  %s460_s13 = scalar_lea.hbm %s702_s2, 256 }
  0x15   : > { %p461_p2 = scmp.lt.u32.totalorder %s622_s5, %s702_s2  ;;  %p462_p3 = scmp.lt.u32.totalorder %s460_s13, %s455_s10 }
  0x16   : > { %p458_p0 = pnand %p457_p13, %p456_p12  ;;  %p464_p5 = scmp.lt.u32.totalorder %s455_s10, %s622_s5 }
  0x17   : > { %p463_p4 = por %p462_p3, %p461_p2 }
  0x18   : > { %p459_p1 = pneg %p458_p0 }
  0x19   : > { %p465_p6 = por %p464_p5, %p463_p4 }
  0x1b   : > { %p466_p8 = pnand %p465_p6, %p459_p1 }
  0x1d   : > { %469 = shalt.err (!%p466_p8)
}
  0x1e   : > { %s470_s16 = scalar_lea.vmem %s630_s7, 128  ;;  %s537_s0 = smov [#allocation5]  }
  0x1f   : > { %p471_p12 = scmp.ne.s32.totalorder %s630_s7, %s470_s16  ;;  %s475_s22 = sshll.u32 %s537_s0, 4  ;;  %s476_s22 = int_to_ptr.vmem [resolvable:$false] %s475_s22 }
  0x20   : > { %s477_s23 = scalar_lea.vmem %s476_s22, 256  ;;  %p478_p11 = scmp.lt.s32.totalorder %s630_s7, %s476_s22 }
  0x21   : > { %p473_p0 = pnand %p471_p12, %p457_p13  ;;  %p479_p2 = scmp.lt.s32.totalorder %s477_s23, %s470_s16 }
  0x23   : > { %p474_p10 = pneg %p473_p0  ;;  %p480_p3 = por %p479_p2, %p478_p11 }
  0x25   : > { %p481_p4 = pnand %p480_p3, %p474_p10 }
  0x27   : > { %484 = shalt.err (!%p481_p4)
}
  0x28   : > { %402 = dma.hbm_to_vmem [thread:$0]  (!%p626_p9), %s622_s5, 128, %s630_s7, %s105_s9  }
  0x29   : > { %p707_p1 = scmp.lt.s32.totalorder %s535_s21, 3  ;;  %p708_p5 = scmp.ge.s32.totalorder %s535_s21, 1 }
  0x2b   : > { %p124_p13 = pnand %p708_p5, %p707_p1 }
  0x2c   : > { %s129_s24 = sand.u32 (!%p124_p13), 1, %s519_s17  }
  0x2d   : > { %127 = sbr.rel (%p124_p13) target bundleno = 97 (0x61), region = 24  ;;  %s380_s27 = sshll.u32 (!%p124_p13), %s129_s24, 3 }
  0x2e   : > { %s130_s28 = scalar_lea.sflag (!%p124_p13), [#allocation6], %s129_s24  ;;  %s133_s29 = scalar_lea.vmem (!%p124_p13), [#allocation5], %s380_s27 }
  0x34   : > { %510 = dma.done.wait (%p609_p7), %s130_s28, 128  }
  0x35   : > { %512 = vsyncadd (%p609_p7), %s130_s28, 4294967168  ;;  %p158_p10 = scmp.lt.s32.totalorder %s527_s19, 1  ;;  %v175_v0 = vlaneseq  ;;  %s174_s30 = sld [smem:[#allocation4]]  ;;  %v167_v4 = vld [vmem:[%s133_s29] sm:$0xff]  ;;  %v538_v20 = vmov 0.0  }
  0x36   : > { %v169_v5 = vcombine.high %v167_v4, %v167_v4  ;;  %v539_v28 = vmov 1966171168  }
  0x37   : > { %s717_s19 = smov (!%p158_p10, %s527_s19), 1  ;;  %v176_v1 = vand.u32 127, %v175_v0  ;;  %v235_v29 = vunpack.c.l.s4 %v539_v28  ;;  %v238_v37 = vshrl.u32 %v175_v0, 7  ;;  %vm251_vm4 = vcmp.lt.s32.totalorder %v175_v0, 256 }
  0x38   : > { %s396_s4 = sshll.u32 %s717_s19, 4  ;;  %s173_s19 = sld [smem:[#allocation3]] }
  0x39   : > { %v177_v2 = vadd.s32 128, %v176_v1  ;;  %s674_s7 = scalar_lea.vmem %s703_s3, %s396_s4  ;;  %v236_v36 = vunpack.c.0.s8 %v235_v29 }
  0x3a   : > { %171 = vst [vmem:[%s674_s7] sm:$0xf] %v167_v4  ;;  %172 = vst [vmem:[%s674_s7 + $0x8] sm:$0xf] %v169_v5 }
  0x3b   : > { %v178_v3 = vstv %s174_s30  ;;  %v239_v46 = vsub.s32 %v236_v36, %v238_v37 }
  0x3c   : > { %v179_v6 = vadd.s32 %v178_v3, %v176_v1  ;;  %v180_v7 = vadd.s32 %v178_v3, %v177_v2 }
  0x3e   : > { %v181_v8 = vcvt.s32.f32 %v179_v6  ;;  %v182_v9 = vcvt.s32.f32 %v180_v7  ;;  %s214_s25 = scvt.s32.f32 %s173_s19 }
  0x40   : > { %v183_v10 = vadd.f32 0.5, %v181_v8  ;;  %v184_v11 = vadd.f32 0.5, %v182_v9  ;;  %v215_v27 = vstv %s214_s25 }
  0x42   : > { %v186_v12 = vmul.f32 0.0625, %v183_v10  ;;  %v187_v13 = vmul.f32 0.0625, %v184_v11 }
  0x44   : > { %v188_v14 = vfloor.f32 %v186_v12  ;;  %v189_v15 = vfloor.f32 %v187_v13 }
  0x46   : > { %v190_v16 = vmul.f32 16.0, %v188_v14  ;;  %v191_v17 = vmul.f32 16.0, %v189_v15 }
  0x48   : > { %v192_v18 = vsub.f32 %v181_v8, %v190_v16  ;;  %v193_v19 = vsub.f32 %v182_v9, %v191_v17 }
  0x4a   : > { %vm194_vm0 = vcmp.ge.f32.partialorder %v192_v18, 16.0  ;;  %vm195_vm1 = vcmp.ge.f32.partialorder %v193_v19, 16.0  ;;  %vm202_vm2 = vcmp.lt.f32.partialorder %v192_v18, 0.0  ;;  %vm203_vm3 = vcmp.lt.f32.partialorder %v193_v19, 0.0 }
  0x4b   : > { %v383_v21 = vsel %vm194_vm0, 1.0, %v538_v20  ;;  %v384_v22 = vsel %vm195_vm1, 1.0, %v538_v20  ;;  %v385_v23 = vsel %vm202_vm2, 1.0, %v538_v20  ;;  %v386_v24 = vsel %vm203_vm3, 1.0, %v538_v20 }
  0x4c   : > { %v200_v25 = vadd.f32 %v383_v21, %v188_v14  ;;  %v201_v26 = vadd.f32 %v384_v22, %v189_v15 }
  0x4e   : > { %v208_v30 = vsub.f32 %v200_v25, %v385_v23  ;;  %v209_v31 = vsub.f32 %v201_v26, %v386_v24 }
  0x50   : > { %v216_v32 = vadd.f32 %v215_v27, %v208_v30  ;;  %v217_v33 = vadd.f32 %v215_v27, %v209_v31  ;;  %v210_v34 = vmul.f32 16.0, %v208_v30  ;;  %v211_v35 = vmul.f32 16.0, %v209_v31 }
  0x52   : > { %v219_v38 = vmul.f32 0.06666667, %v216_v32  ;;  %v220_v39 = vmul.f32 0.06666667, %v217_v33  ;;  %v212_v40 = vsub.f32 %v181_v8, %v210_v34  ;;  %v213_v41 = vsub.f32 %v182_v9, %v211_v35 }
  0x54   : > { %v221_v42 = vmul.f32 2.0, %v219_v38  ;;  %v222_v43 = vmul.f32 2.0, %v220_v39  ;;  %v225_v44 = vmul.f32 0.06666667, %v212_v40  ;;  %v226_v45 = vmul.f32 0.06666667, %v213_v41 }
  0x56   : > { %v387_v47 = vadd.f32 -1.0, %v221_v42  ;;  %v388_v48 = vadd.f32 -1.0, %v222_v43  ;;  %v227_v49 = vmul.f32 2.0, %v225_v44  ;;  %v228_v50 = vmul.f32 2.0, %v226_v45 }
  0x58   : > { %v233_v51 = vcombine.low %v387_v47, %v388_v48  ;;  %v389_v52 = vadd.f32 -1.0, %v227_v49  ;;  %v390_v53 = vadd.f32 -1.0, %v228_v50 }
  0x5a   : > { %v240_v54 = vrot.slane %v233_v51, %v239_v46  ;;  %v258_v55 = vcombine.low %v389_v52, %v390_v53 }
  0x5c   : > { %v247_v56 = vrot.slane %v240_v54, %v239_v46  ;;  %v265_v57 = vrot.slane %v258_v55, %v239_v46 }
  0x5e   : > { %391 = vst.msk [vmem:[%s674_s7 + $0x4] ss:$8 sm:$0x3] %vm251_vm4, %v247_v56  ;;  %v272_v58 = vrot.slane %v265_v57, %v239_v46 }
  0x60   : > { %392 = vst.msk [vmem:[%s674_s7 + $0x5] ss:$8 sm:$0x3] %vm251_vm4, %v272_v58 }
  0x61 PF: > { %s18_s21 = sadd.s32 1, %s535_s21   ;;  %s709_s16 = smov %s519_s17 }
  0x62   : > { %p15_p7 = scmp.ge.s32.totalorder %s18_s21, 4   ;;  %s710_s17 = smov %s523_s18 }
  0x63   : > { %s711_s18 = smov %s615_s26  ;;  %s712_s19 = smov %s531_s20 }
  0x64   : > { %s713_s20 = smov %s715_s1  ;;  %17 = sbr.rel (!%p15_p7) target bundleno = 7 (0x7), region = 66 }
  0x6b   :  { %307 = vsyncpa [#allocation6], 1 }
  0x6c   :  { %309 = vsyncpa [#allocation6 + $0x1], 1 }

</bundles_post_ra>
